<compile_context>
chip_gen: v6e
topology: v6e:2x2x1
jax: 0.10.0
libtpu: 0.0.40
codegen_flags: <defaults>
</compile_context>

<pallas_src>
import functools

import jax
import jax.numpy as jnp
from jax.experimental import pallas as pl
from jax.experimental.pallas import tpu as pltpu

IN_FEATURES = 784
OUT_FEATURES = 10
PADDED_OUT = 128  # lane-dense output / MXU-native N


def linear_kernel(x_ref, w_ref, b_ref, o_ref):
    # x_ref: (tb, 784) in the caller's native dtype. Cast in VMEM to the compute
    # dtype (== w_ref.dtype, e.g. bf16); the cast is VPU work hidden under the
    # next tile's DMA, while HBM only ever sees x in its original dtype.
    x = x_ref[...].astype(w_ref.dtype)
    acc = jnp.dot(x, w_ref[...], preferred_element_type=jnp.float32)
    o_ref[...] = (acc + b_ref[...]).astype(o_ref.dtype)


def prepare_params(weight, bias, compute_dtype=jnp.bfloat16):
    """Pad/cast nn.Linear params once (hoisted out of the per-call path).

    weight: (10, 784) as in torch.nn.Linear; bias: (10,).
    Pass compute_dtype=jnp.float32 to opt out of bf16 compute.
    """
    w_pad = jnp.zeros((IN_FEATURES, PADDED_OUT), dtype=compute_dtype)
    w_pad = w_pad.at[:, :OUT_FEATURES].set(weight.T.astype(compute_dtype))
    b_pad = jnp.zeros((1, PADDED_OUT), dtype=jnp.float32)
    b_pad = b_pad.at[:, :OUT_FEATURES].set(bias.astype(jnp.float32))
    return w_pad, b_pad


def _round_up(v, m):
    return ((v + m - 1) // m) * m


def logistic_regression_forward(x, w_pad, b_pad, *, block_b=1024,
                                x_buffer_count=None):
    """x: any shape with prod(trailing dims) == 784 (e.g. (B, 1, 28, 28)).
    w_pad/b_pad: from prepare_params(). Returns (B, 10) in x's dtype."""
    x2d = x.reshape(-1, IN_FEATURES)            # flatten like x.view(-1, 784)
    B = x2d.shape[0]
    out_dtype = x2d.dtype

    # Batch tile: multiple of the sublane pack for x's dtype, capped so that
    # there are >= 2 grid steps whenever B allows it (v7x: one step per TC).
    sub = 16 if x2d.dtype == jnp.dtype(jnp.bfloat16) else 8
    tb = min(block_b, _round_up(pl.cdiv(B, 2), sub))
    tb = max(sub, _round_up(tb, sub))
    grid_steps = pl.cdiv(B, tb)   # ragged last block handled by Pallas masking

    x_spec_kwargs = {}
    if x_buffer_count is not None:   # e.g. 3 on v5e when many small steps remain
        x_spec_kwargs["pipeline_mode"] = pl.Buffered(x_buffer_count)

    bytes_accessed = (x2d.size * x2d.dtype.itemsize
                      + w_pad.size * w_pad.dtype.itemsize
                      + b_pad.size * b_pad.dtype.itemsize
                      + B * PADDED_OUT * jnp.dtype(out_dtype).itemsize)
    cost = pl.CostEstimate(
        flops=2 * B * IN_FEATURES * PADDED_OUT,
        transcendentals=0,
        bytes_accessed=bytes_accessed,
    )

    out = pl.pallas_call(
        linear_kernel,
        out_shape=jax.ShapeDtypeStruct((B, PADDED_OUT), out_dtype),
        grid_spec=pltpu.PrefetchScalarGridSpec(
            num_scalar_prefetch=0,
            grid=(grid_steps,),
            in_specs=[
                # batch-tiled input in native dtype: pipelined across grid steps
                pl.BlockSpec((tb, IN_FEATURES), lambda i: (i, 0),
                             **x_spec_kwargs),
                # weight / bias stay resident in VMEM across all steps
                pl.BlockSpec((IN_FEATURES, PADDED_OUT), lambda i: (0, 0)),
                pl.BlockSpec((1, PADDED_OUT), lambda i: (0, 0)),
            ],
            out_specs=pl.BlockSpec((tb, PADDED_OUT), lambda i: (i, 0)),
        ),
        compiler_params=pltpu.CompilerParams(
            dimension_semantics=("parallel",)),
        cost_estimate=cost,
    )(x2d, w_pad, b_pad)

    # Lane-padding slice; fuses with the consumer under jit. Output is already
    # in out_dtype, so there is no separate convert pass.
    return out[:, :OUT_FEATURES]


if __name__ == "__main__":
    key = jax.random.PRNGKey(0)
    kx, kw, kb = jax.random.split(key, 3)

    # Deterministic init matching torch.nn.Linear's U(-1/sqrt(in), 1/sqrt(in)).
    bound = 1.0 / (IN_FEATURES ** 0.5)
    weight = jax.random.uniform(kw, (OUT_FEATURES, IN_FEATURES),
                                jnp.float32, minval=-bound, maxval=bound)
    bias = jax.random.uniform(kb, (OUT_FEATURES,),
                              jnp.float32, minval=-bound, maxval=bound)

    # Params padded/cast exactly once.
    w_pad, b_pad = prepare_params(weight, bias)

    # Small MNIST-like batch, deliberately NOT a multiple of the tile so the
    # ragged last block (no jnp.pad pass) and a 2-step grid are exercised.
    B = 20
    x = jax.random.normal(kx, (B, 1, 28, 28), jnp.float32)

    fwd = jax.jit(functools.partial(logistic_regression_forward, block_b=1024))
    out = jax.block_until_ready(fwd(x, w_pad, b_pad))

    # Sanity check against plain-JAX f32 reference (bf16 compute -> loose tol).
    ref = x.reshape(-1, IN_FEATURES) @ weight.T + bias
    assert out.shape == (B, OUT_FEATURES)
    assert out.dtype == x.dtype
    assert jnp.allclose(out, ref, atol=2e-2, rtol=2e-2)

    print("KERNEL_OK")
</pallas_src>

<mosaic_0001>
module attributes {stable_mosaic.version = 11 : i64} {
  func.func @linear_kernel(%arg0: i32, %arg1: memref<16x784xf32, #tpu.memory_space<vmem>>, %arg2: memref<784x128xbf16, #tpu.memory_space<vmem>>, %arg3: memref<1x128xf32, #tpu.memory_space<vmem>>, %arg4: memref<16x128xf32, #tpu.memory_space<vmem>>) attributes {dimension_semantics = [#tpu.dimension_semantics<parallel>], iteration_bounds = array<i64: 2>, scalar_prefetch = 0 : i64, scratch_operands = 0 : i64, tpu.core_type = #tpu.core_type<tc>, window_params = [{transform_indices = @transform_0, window_bounds = array<i64: 16, 784>}, {pipeline_mode = #tpu.pipeline_mode<synchronous>, transform_indices = @transform_1, window_bounds = array<i64: 784, 128>}, {pipeline_mode = #tpu.pipeline_mode<synchronous>, transform_indices = @transform_2, window_bounds = array<i64: 1, 128>}, {transform_indices = @transform_3, window_bounds = array<i64: 16, 128>}]} {
    %c0 = arith.constant 0 : index
    %c0_0 = arith.constant 0 : index
    %0 = vector.load %arg1[%c0, %c0_0] : memref<16x784xf32, #tpu.memory_space<vmem>>, vector<16x784xf32>
    %1 = arith.truncf %0 : vector<16x784xf32> to vector<16x784xbf16>
    %c0_1 = arith.constant 0 : index
    %c0_2 = arith.constant 0 : index
    %2 = vector.load %arg2[%c0_1, %c0_2] : memref<784x128xbf16, #tpu.memory_space<vmem>>, vector<784x128xbf16>
    %cst = arith.constant dense<0.000000e+00> : vector<16x128xf32>
    %3 = tpu.matmul %1, %2, %cst {dimension_numbers = #tpu.dot_dimension_numbers<[1], [0], [0], [1], [0, 0, 1, 1], [], []>} : vector<16x784xbf16>, vector<784x128xbf16>, vector<16x128xf32> -> vector<16x128xf32>
    %c0_3 = arith.constant 0 : index
    %c0_4 = arith.constant 0 : index
    %4 = vector.load %arg3[%c0_3, %c0_4] : memref<1x128xf32, #tpu.memory_space<vmem>>, vector<1x128xf32>
    %5 = vector.broadcast %4 : vector<1x128xf32> to vector<16x128xf32>
    %6 = arith.addf %3, %5 : vector<16x128xf32>
    %c0_5 = arith.constant 0 : index
    %c0_6 = arith.constant 0 : index
    %7 = vector.load %arg4[%c0_5, %c0_6] : memref<16x128xf32, #tpu.memory_space<vmem>>, vector<16x128xf32>
    tpu.vector_store %arg4[%c0_5, %c0_6], %6 {strides = array<i32>} : memref<16x128xf32, #tpu.memory_space<vmem>>, vector<16x128xf32>,
    return
  }
  func.func @transform_0(%arg0: i32) -> (i32, i32) {
    %c0_i32 = arith.constant 0 : i32
    %c0_i32_0 = arith.constant 0 : i32
    return %arg0, %c0_i32 : i32, i32
  }
  func.func @transform_1(%arg0: i32) -> (i32, i32) {
    %c0_i32 = arith.constant 0 : i32
    %c0_i32_0 = arith.constant 0 : i32
    %c0_i32_1 = arith.constant 0 : i32
    return %c0_i32, %c0_i32_0 : i32, i32
  }
  func.func @transform_2(%arg0: i32) -> (i32, i32) {
    %c0_i32 = arith.constant 0 : i32
    %c0_i32_0 = arith.constant 0 : i32
    %c0_i32_1 = arith.constant 0 : i32
    return %c0_i32, %c0_i32_0 : i32, i32
  }
  func.func @transform_3(%arg0: i32) -> (i32, i32) {
    %c0_i32 = arith.constant 0 : i32
    %c0_i32_0 = arith.constant 0 : i32
    return %arg0, %c0_i32 : i32, i32
  }
}

</mosaic_0001>

<bundles_post_ra>
// kernel: logistic_regression_forward.1
= control target key start
LH: loop header
LB: loop body
LE: loop exit
PB: predicated region body
PF: predicated region fallthrough
CT: control target
= control target key end

     0   :  { %s1413_s12 = smov 0   ;;  %s1415_s13 = smov 0   ;;  %s1662_s0 = inlined_call_operand.vmem [shape: f32[20,784], index: 0, kind: input, shape index: {}]   ;;  %s1663_s1 = inlined_call_operand.vmem [shape: bf16[784,128], index: 1, kind: input, shape index: {}]   ;;  %s1664_s2 = inlined_call_operand.vmem [shape: f32[1,128], index: 2, kind: input, shape index: {}]   ;;  %s1665_s3 = inlined_call_operand.vmem [shape: f32[20,128], index: 3, kind: output, shape index: {}]  }
   0x1   :  { %s1417_s14 = smov 0  }
   0x2 LB: > { %s1426_s15 = sadd.s32 4294967295, %s1357_s14   ;;  %s1428_s16 = sadd.s32 1, %s1357_s14   ;;  %s1357_s14 = sphi %s1417_s14, %s1669_s14   ;;  %s1353_s13 = sphi %s1415_s13, %s1668_s13   ;;  %s1349_s12 = sphi %s1413_s12, %s1667_s12  }
   0x3   : > { %s85_s17 = ssub.s32 %s1357_s14, %s1428_s16  ;;  %s88_s18 = sadd.s32 1, %s1353_s13 }
   0x4   : > { %p86_p0 = scmp.eq.s32.totalorder %s85_s17, 0  ;;  %p98_p1 = scmp.ne.s32.totalorder %s1353_s13, %s1349_s12 }
   0x5   : > { %p99_p2 = scmp.eq.s32.totalorder %s1426_s15, 1  ;;  %p1014_p3 = scmp.ge.s32.totalorder %s1357_s14, 1 }
   0x6   : > { %s1436_s19 = scalar_select %p86_p0, %s1353_s13, %s88_s18  }
   0x7   : > { %p1438_p4 = por %p99_p2, %p98_p1  ;;  %p149_p5 = scmp.lt.s32.totalorder %s1357_s14, 3 }
   0x9   : > { %p150_p6 = pnand %p1014_p3, %p149_p5 }
   0xa   : > { %s1485_s28 = sshll.u32 (!%p150_p6), %s1426_s15, 1 }
   0xb   : > { %153 = sbr.rel (%p150_p6) target bundleno = 326 (0x146), region = 32  ;;  %p184_p7 = scmp.lt.s32.totalorder (!%p150_p6), %s1485_s28, 2 }
  0x10   : > { %v1254_v0 = vld [vmem:[%s1663_s1 + $0x78] sm:$0xff]   ;;  %v1258_v4 = vld [vmem:[%s1663_s1 + $0x70] sm:$0xff]   ;;  %v1262_v8 = vld [vmem:[%s1663_s1 + $0x68] sm:$0xff]   ;;  %s185_s22 = scalar_select %p184_p7, %s1485_s28, 2  ;;  %v1391_v43 = vmov 0.0   ;;  %vm1392_vm0 = vmmov 0  }
  0x11   : > { %v1255_v1 = vld [vmem:[%s1663_s1 + $0x38] sm:$0xff]   ;;  %1089 = vmatprep.subr.bf16.mxu0 %v1254_v0  ;;  %v1259_v5 = vld [vmem:[%s1663_s1 + $0x30] sm:$0xff]   ;;  %v1263_v9 = vld [vmem:[%s1663_s1 + $0x28] sm:$0xff]   ;;  %vm621_vm1 = vcmask 130048   ;;  %s1086_s30 = sshll.u32 (%p1438_p4), %s1426_s15, 4 }
  0x12   : > { %v1256_v2 = vld [vmem:[%s1663_s1 + $0xf8] sm:$0xff]   ;;  %1090 = vmatpush3.bf16.msra.mxu0 %v1255_v1  ;;  %v1260_v6 = vld [vmem:[%s1663_s1 + $0xf0] sm:$0xff]   ;;  %v1264_v10 = vld [vmem:[%s1663_s1 + $0xe8] sm:$0xff]   ;;  %s1163_s5 = smul.u32 56, %s185_s22  ;;  %s1628_s6 = scalar_lea.vmem (%p1438_p4), %s1665_s3, %s1086_s30  }
  0x13   : > { %v1257_v3 = vld [vmem:[%s1663_s1 + $0xb8] sm:$0xff]   ;;  %1111 = vmatprep.subr.bf16.mxu1 %v1256_v2  ;;  %1091 = vmatprep.subr.bf16.mxu0 %v1258_v4  ;;  %v1261_v7 = vld [vmem:[%s1663_s1 + $0xb0] sm:$0xff]   ;;  %v1265_v11 = vld [vmem:[%s1663_s1 + $0xa8] sm:$0xff]  }
  0x14   : > { %1112 = vmatpush3.bf16.msra.mxu1 %v1257_v3  ;;  %v1266_v12 = vld [vmem:[%s1663_s1 + $0x60] sm:$0xff]   ;;  %v1270_v16 = vld [vmem:[%s1663_s1 + $0x58] sm:$0xff]   ;;  %v1274_v20 = vld [vmem:[%s1663_s1 + $0x50] sm:$0xff]   ;;  %s1537_s22 = scalar_lea.vmem %s1662_s0, %s1163_s5 }
  0x15   : > { %1113 = vmatprep.subr.bf16.mxu1 %v1260_v6  ;;  %v1267_v13 = vld [vmem:[%s1663_s1 + $0x20] sm:$0xff]   ;;  %v1271_v17 = vld [vmem:[%s1663_s1 + $0x18] sm:$0xff]   ;;  %v1275_v21 = vld [vmem:[%s1663_s1 + $0x10] sm:$0xff]  }
  0x16   : > { %1092 = vmatpush3.bf16.msra.mxu0 %v1259_v5  ;;  %v1268_v14 = vld [vmem:[%s1663_s1 + $0xe0] sm:$0xff]   ;;  %v1272_v18 = vld [vmem:[%s1663_s1 + $0xd8] sm:$0xff]   ;;  %v1276_v22 = vld [vmem:[%s1663_s1 + $0xd0] sm:$0xff]  }
  0x17   : > { %1093 = vmatprep.subr.bf16.mxu0 %v1262_v8  ;;  %v1269_v15 = vld [vmem:[%s1663_s1 + $0xa0] sm:$0xff]   ;;  %v1273_v19 = vld [vmem:[%s1663_s1 + $0x98] sm:$0xff]   ;;  %v1277_v23 = vld [vmem:[%s1663_s1 + $0x90] sm:$0xff]  }
  0x18   : > { %1114 = vmatpush3.bf16.msra.mxu1 %v1261_v7  ;;  %v1278_v24 = vld [vmem:[%s1663_s1 + $0x48] sm:$0xff]   ;;  %v1282_v28 = vld [vmem:[%s1663_s1 + $0x40] sm:$0xff]   ;;  %v208_v36 = vld [vmem:[%s1537_s22 + $0x38] sm:$0xff] }
  0x19   : > { %1115 = vmatprep.subr.bf16.mxu1 %v1264_v10  ;;  %v1279_v25 = vld [vmem:[%s1663_s1 + $0x8] sm:$0xff]   ;;  %v1283_v29 = vld [vmem:[%s1663_s1] sm:$0xff]   ;;  %v1286_v38 = vld [vmem:[%s1663_s1 + $0x178] sm:$0xff]  }
  0x1a   : > { %1094 = vmatpush3.bf16.msra.mxu0 %v1263_v9  ;;  %v1280_v26 = vld [vmem:[%s1663_s1 + $0xc8] sm:$0xff]   ;;  %v1284_v30 = vld [vmem:[%s1663_s1 + $0xc0] sm:$0xff]   ;;  %v204_v39 = vld [vmem:[%s1537_s22 + $0x18] sm:$0xff] }
  0x1b   : > { %1095 = vmatprep.subr.bf16.mxu0 %v1266_v12  ;;  %v1281_v27 = vld [vmem:[%s1663_s1 + $0x88] sm:$0xff]   ;;  %v209_v32 = vld [vmem:[%s1537_s22 + $0x40] sm:$0xff]  ;;  %v211_v40 = vld [vmem:[%s1537_s22 + $0x50] sm:$0xff] }
  0x1c   : > { %1116 = vmatpush3.bf16.msra.mxu1 %v1265_v11  ;;  %v202_v31 = vld [vmem:[%s1537_s22 + $0x8] sm:$0xff]  ;;  %v1285_v34 = vld [vmem:[%s1663_s1 + $0x80] sm:$0xff]   ;;  %v218_v41 = vpack.c.bf16 %v211_v40, %v204_v39  ;;  %v1287_v42 = vld [vmem:[%s1663_s1 + $0x138] sm:$0xff]  }
  0x1d   : > { %1117 = vmatprep.subr.bf16.mxu1 %v1268_v14  ;;  %v216_v33 = vpack.c.bf16 %v209_v32, %v202_v31  ;;  %v201_v35 = vld [vmem:[%s1537_s22] sm:$0xff]  ;;  %v203_v44 = vld [vmem:[%s1537_s22 + $0x10] sm:$0xff]  ;;  %v210_v45 = vld [vmem:[%s1537_s22 + $0x48] sm:$0xff] }
  0x1e   : > { %1096 = vmatpush3.bf16.msra.mxu0 %v1267_v13  ;;  %v215_v37 = vpack.c.bf16 %v208_v36, %v201_v35  ;;  %698 = vmatprep.mubr.bf16.mxu1 %v218_v41  ;;  %v217_v46 = vpack.c.bf16 %v210_v45, %v203_v44  ;;  %v1288_v47 = vld [vmem:[%s1663_s1 + $0x170] sm:$0xff]   ;;  %v1290_v49 = vld [vmem:[%s1663_s1 + $0x168] sm:$0xff]   ;;  %v1292_v51 = vld [vmem:[%s1663_s1 + $0x160] sm:$0xff]  }
  0x1f   : > { %1097 = vmatprep.subr.bf16.mxu0 %v1270_v16  ;;  %657 = vmatprep.mubr.bf16.mxu0 %v216_v33  ;;  %v1289_v48 = vld [vmem:[%s1663_s1 + $0x130] sm:$0xff]   ;;  %v1291_v50 = vld [vmem:[%s1663_s1 + $0x128] sm:$0xff]   ;;  %v1293_v52 = vld [vmem:[%s1663_s1 + $0x120] sm:$0xff]  }
  0x20   : > { %1118 = vmatpush3.bf16.msra.mxu1 %v1269_v15  ;;  %v1294_v53 = vld [vmem:[%s1663_s1 + $0x158] sm:$0xff]   ;;  %v1296_v55 = vld [vmem:[%s1663_s1 + $0x150] sm:$0xff]   ;;  %v1302_v56 = vld [vmem:[%s1663_s1 + $0x180] sm:$0xff]  }
  0x21   : > { %1119 = vmatprep.subr.bf16.mxu1 %v1272_v18  ;;  %v1295_v54 = vld [vmem:[%s1663_s1 + $0x118] sm:$0xff]   ;;  %v206_v57 = vld [vmem:[%s1537_s22 + $0x28] sm:$0xff]  ;;  %v213_v58 = vld [vmem:[%s1537_s22 + $0x60] sm:$0xff] }
  0x22   : > { %1098 = vmatpush3.bf16.msra.mxu0 %v1271_v17  ;;  %v1297_v59 = vld [vmem:[%s1663_s1 + $0x110] sm:$0xff]   ;;  %v220_v60 = vpack.c.bf16 %v213_v58, %v206_v57  ;;  %v214_v62 = vld [vmem:[%s1537_s22 + $0x68] sm:$0xff]  ;;  %v1300_v2 = vld [vmem:[%s1663_s1 + $0x140] sm:$0xff]  }
  0x23   : > { %1099 = vmatprep.subr.bf16.mxu0 %v1274_v20  ;;  %v207_v61 = vld [vmem:[%s1537_s22 + $0x30] sm:$0xff]  ;;  %v1298_v63 = vld [vmem:[%s1663_s1 + $0x148] sm:$0xff]   ;;  %v1301_v3 = vld [vmem:[%s1663_s1 + $0x100] sm:$0xff]  }
  0x24   : > { %1120 = vmatpush3.bf16.msra.mxu1 %v1273_v19  ;;  %v221_v0 = vpack.c.bf16 %v214_v62, %v207_v61  ;;  %v1299_v1 = vld [vmem:[%s1663_s1 + $0x108] sm:$0xff]   ;;  %v205_v4 = vld [vmem:[%s1537_s22 + $0x20] sm:$0xff]  ;;  %v212_v5 = vld [vmem:[%s1537_s22 + $0x58] sm:$0xff]  ;;  %s175_s22 = sand.u32 1, %s1349_s12   ;;  %s799_s12 = ssub.s32 (%p1438_p4), 3, %s1485_s28 }
  0x25   : > { %1121 = vmatprep.subr.bf16.mxu1 %v1276_v22  ;;  %v219_v6 = vpack.c.bf16 %v212_v5, %v205_v4  ;;  %v1018_v19 = vld [vmem:[%s1664_s2] ss:$0 sm:$0xff]  ;;  %s1015_s27 = sshll.u32 %s175_s22, 4  ;;  %p800_p8 = scmp.lt.s32.totalorder (%p1438_p4), %s799_s12, 2 }
  0x26   : > { %1100 = vmatpush3.bf16.msra.mxu0 %v1275_v21  ;;  %s1617_s29 = scalar_lea.vmem [#allocation2], %s1015_s27  }
  0x27   : > { %1101 = vmatprep.subr.bf16.mxu0 %v1278_v24 }
  0x28   : > { %1122 = vmatpush3.bf16.msra.mxu1 %v1277_v23 }
  0x29   : > { %1123 = vmatprep.subr.bf16.mxu1 %v1280_v26 }
  0x2a   : > { %1102 = vmatpush3.bf16.msra.mxu0 %v1279_v25 }
  0x2b   : > { %1103 = vmatprep.subr.bf16.mxu0 %v1282_v28 }
  0x2c   : > { %1124 = vmatpush3.bf16.msra.mxu1 %v1281_v27 }
  0x2d   : > { %1125 = vmatprep.subr.bf16.mxu1 %v1284_v30 }
  0x2e   : > { %1104 = vmatpush3.bf16.msra.mxu0 %v1283_v29 }
  0x2f   : > { %1133 = vmatprep.subr.bf16.mxu0 %v1286_v38 }
  0x30   : > { %1126 = vmatpush3.bf16.msra.mxu1 %v1285_v34 }
  0x31   : > { %1157 = vmatprep.subr.bf16.mxu1 %v1391_v43  ;;  %658 = vmatmul.mubr.bf16.vlgmr.msra.gmra.mxu0 %v215_v37 }
  0x32   : > { %1134 = vmatpush3.bf16.msra.mxu0 %v1287_v42  ;;  %739 = vmatprep.mubr.bf16.mxu0 %v220_v60 }
  0x33   : > { %699 = vmatmul.mubr.bf16.vlgmr.msra.gmra.mxu1 %v217_v46  ;;  %1135 = vmatprep.subr.bf16.mxu0 %v1288_v47 }
  0x34   : > { %1159 = vmatprep.mubr.msk.bf16.mxu1 %vm1392_vm0, %v1391_v43  ;;  %1158 = vmatpush3.bf16.msra.mxu1 %v1302_v56 }
  0x36   : > { %1136 = vmatpush3.bf16.msra.mxu0 %v1289_v48 }
  0x37   : > { %1137 = vmatprep.subr.bf16.mxu0 %v1290_v49 }
  0x3a   : > { %1138 = vmatpush3.bf16.msra.mxu0 %v1291_v50 }
  0x3b   : > { %1139 = vmatprep.subr.bf16.mxu0 %v1292_v51  ;;  %1160 = vmatmul.mubr.msk.bf16.vlgmr.msra.gmra.mxu1 %vm621_vm1, %v221_v0 }
  0x3e   : > { %1140 = vmatpush3.bf16.msra.mxu0 %v1293_v52 }
  0x3f   : > { %1141 = vmatprep.subr.bf16.mxu0 %v1294_v53 }
  0x42   : > { %1142 = vmatpush3.bf16.msra.mxu0 %v1295_v54 }
  0x43   : > { %1143 = vmatprep.subr.bf16.mxu0 %v1296_v55 }
  0x46   : > { %1144 = vmatpush3.bf16.msra.mxu0 %v1297_v59 }
  0x47   : > { %1145 = vmatprep.subr.bf16.mxu0 %v1298_v63 }
  0x4a   : > { %1146 = vmatpush3.bf16.msra.mxu0 %v1299_v1 }
  0x4b   : > { %1147 = vmatprep.subr.bf16.mxu0 %v1300_v2 }
  0x4e   : > { %1148 = vmatpush3.bf16.msra.mxu0 %v1301_v3 }
  0x51   : > { %740 = vmatmul.mubr.bf16.vlgmr.msra.gmra.mxu0 %v219_v6 }
  0xf1   : > { %v1105_v10 = vpop.f32.mrf.mxu0 }
  0xf3   : > { %v1127_v7 = vpop.f32.mrf.mxu1  ;;  %v1106_v12 = vpop.f32.mrf.mxu0 }
  0xf4   : > { %v1107_v18 = vadd.f32 %v1106_v12, %v1105_v10 }
  0xf5   : > { %v1128_v8 = vpop.f32.mrf.mxu1  ;;  %v1108_v15 = vpop.f32.mrf.mxu0 }
  0xf6   : > { %v660_v21 = vadd.f32 %v1107_v18, %v1018_v19  ;;  %v1129_v22 = vadd.f32 %v1128_v8, %v1127_v7 }
  0xf7   : > { %v1130_v9 = vpop.f32.mrf.mxu1  ;;  %v1109_v20 = vpop.f32.mrf.mxu0 }
  0xf8   : > { %v1110_v23 = vadd.f32 %v1109_v20, %v1108_v15  ;;  %v701_v26 = vadd.f32 %v1129_v22, %v660_v21 }
  0xf9   : > { %v1131_v11 = vpop.f32.mrf.mxu1 }
  0xfa   : > { %v663_v27 = vadd.f32 %v1110_v23, %v1018_v19  ;;  %v1132_v28 = vadd.f32 %v1131_v11, %v1130_v9 }
  0xfb   : > { %v782_v13 = vpop.f32.mrf.mxu1 }
  0xfc   : > { %v704_v33 = vadd.f32 %v1132_v28, %v663_v27 }
  0xfd   : > { %v1161_v14 = vpop.f32.mrf.mxu1 }
  0xff   : > { %v785_v16 = vpop.f32.mrf.mxu1 }
 0x101   : > { %v1162_v17 = vpop.f32.mrf.mxu1 }
 0x111   : > { %v1149_v24 = vpop.f32.mrf.mxu0 }
 0x113   : > { %v1150_v25 = vpop.f32.mrf.mxu0 }
 0x114   : > { %v1151_v29 = vadd.f32 %v1150_v25, %v1149_v24 }
 0x115   : > { %v1152_v30 = vpop.f32.mrf.mxu0 }
 0x116   : > { %v742_v31 = vadd.f32 %v1151_v29, %v701_v26 }
 0x117   : > { %v1153_v32 = vpop.f32.mrf.mxu0 }
 0x118   : > { %v783_v34 = vadd.f32 %v782_v13, %v742_v31  ;;  %v1154_v35 = vadd.f32 %v1153_v32, %v1152_v30 }
 0x11a   : > { %789 = vst [vmem:[%s1617_s29] sm:$0xff] %v783_v34  ;;  %v745_v36 = vadd.f32 %v1154_v35, %v704_v33  ;;  %797 = sbr.rel (!%p1438_p4) target bundleno = 326 (0x146), region = 36 }
 0x11c   : > { %v786_v37 = vadd.f32 %v785_v16, %v745_v36 }
 0x11e   : > { %790 = vst [vmem:[%s1617_s29 + $0x8] sm:$0xff] %v786_v37 }
 0x11f   : > { %s1671_s12 = smov (!%p800_p8, %s799_s12), 2 }
 0x120   : > { %s1071_s7 = sshll.u32 %s1671_s12, 7 }
 0x121   : > { %p1074_p9 = scmp.eq.s32.totalorder %s1071_s7, 0 }
 0x122   : > { %s1634_s8 = sshrl.u32 (!%p1074_p9), %s1671_s12, 1 }
 0x123   : > { %808 = sbr.rel (%p1074_p9) target bundleno = 326 (0x146), region = 40  ;;  %p1075_p10 = scmp.le.s32.totalorder (!%p1074_p9), %s1634_s8, 0 }
 0x128   : > { %967 = sbr.rel (%p1075_p10) target bundleno = 309 (0x135), region = 116  ;;  %s1359_s15 = smov (!%p1075_p10), %s1628_s6  }
 0x129   : > { %s1363_s20 = smov (!%p1075_p10), %s1617_s29   ;;  %s1367_s28 = smov (!%p1075_p10), 0  }
 0x12a   : > { %s1371_s9 = smov (!%p1075_p10), 0  }
 0x12d LB: >> { %v873_v38 = vld [vmem:[%s1365_s20] sm:$0xff]  ;;  %v875_v39 = vld [vmem:[%s1365_s20 + $0x8] sm:$0xff]  ;;  %s877_s10 = sadd.s32 1, %s1369_s28  ;;  %s867_s9 = sadd.s32 1, %s1373_s9   ;;  %s1373_s9 = sphi %s1371_s9, %s867_s9   ;;  %s1369_s28 = sphi %s1367_s28, %s1368_s28   ;;  %s1365_s20 = sphi %s1363_s20, %s882_s20   ;;  %s1361_s15 = sphi %s1359_s15, %s883_s15  }
 0x12e   : >> { %874 = vst [vmem:[%s1361_s15] sm:$0xff] %v873_v38  ;;  %876 = vst [vmem:[%s1361_s15 + $0x8] sm:$0xff] %v875_v39  ;;  %p878_p11 = scmp.ge.s32.totalorder %s877_s10, %s1634_s8  ;;  %p866_p12 = scmp.ge.s32.totalorder %s867_s9, %s1634_s8 }
 0x130   : >> { %s1673_s10 = smov (%p878_p11, %s877_s10), 0  ;;  %869 = sbr.rel (!%p866_p12) target bundleno = 301 (0x12d), region = 122 }
 0x131   : >> { %s1076_s11 = sshll.u32 %s1673_s10, 4  ;;  %s1368_s28 = smov %s1673_s10  }
 0x132   : >> { %s882_s20 = scalar_lea.vmem %s1617_s29, %s1076_s11 [#allocation2]   ;;  %s883_s15 = scalar_lea.vmem %s1628_s6, %s1076_s11  }
 0x135 PF: > { %s1644_s14 = sand.u32 1, %s1671_s12   ;;  %s1087_s17 = sshll.u32 %s1634_s8, 4 }
 0x136   : > { %s888_s18 = scalar_lea.vmem %s1617_s29, %s1087_s17 [#allocation2]   ;;  %s890_s21 = scalar_lea.vmem %s1628_s6, %s1087_s17  }
 0x137   : > { %p1081_p13 = scmp.le.s32.totalorder %s1644_s14, 0 }
 0x138   : > { %s1375_s23 = smov (!%p1081_p13), %s890_s21   ;;  %s1379_s24 = smov (!%p1081_p13), %s888_s18  }
 0x139   : > { %981 = sbr.rel (%p1081_p13) target bundleno = 326 (0x146), region = 127  ;;  %s1383_s25 = smov (!%p1081_p13), 0  }
 0x13a   : > { %s1387_s26 = smov (!%p1081_p13), 0  }
 0x13e LB: >> { %v900_v40 = vld [vmem:[%s1381_s24] sm:$0xff]  ;;  %s902_s22 = sadd.s32 1, %s1385_s25  ;;  %s894_s26 = sadd.s32 1, %s1389_s26   ;;  %s1389_s26 = sphi %s1387_s26, %s894_s26   ;;  %s1385_s25 = sphi %s1383_s25, %s1384_s25   ;;  %s1381_s24 = sphi %s1379_s24, %s907_s24   ;;  %s1377_s23 = sphi %s1375_s23, %s908_s23  }
 0x13f   : >> { %901 = vst [vmem:[%s1377_s23] sm:$0xff] %v900_v40  ;;  %p903_p0 = scmp.ge.s32.totalorder %s902_s22, %s1644_s14  ;;  %p893_p1 = scmp.ge.s32.totalorder %s894_s26, %s1644_s14 }
 0x141   : >> { %s1675_s22 = smov (%p903_p0, %s902_s22), 0  ;;  %896 = sbr.rel (!%p893_p1) target bundleno = 318 (0x13e), region = 133 }
 0x142   : >> { %s1082_s27 = sshll.u32 %s1675_s22, 3  ;;  %s1384_s25 = smov %s1675_s22  }
 0x143   : >> { %s907_s24 = scalar_lea.vmem %s888_s18, %s1082_s27 [#allocation2]   ;;  %s908_s23 = scalar_lea.vmem %s890_s21, %s1082_s27  }
 0x146 PF: > { %p10_p2 = scmp.ge.s32.totalorder %s1428_s16, 4   ;;  %s1667_s12 = smov %s1353_s13 }
 0x147   : > { %s1668_s13 = smov %s1436_s19  ;;  %s1669_s14 = smov %s1428_s16 }
 0x148   :  { %12 = sbr.rel (!%p10_p2) target bundleno = 2 (0x2), region = 144 }

</bundles_post_ra>
